<compile_context>
chip_gen: v5e
topology: v5e:2x2
jax: 0.10.0
libtpu: 0.0.40
codegen_flags: <defaults>
</compile_context>

<pallas_src>
import math
import functools

import jax
import jax.numpy as jnp
from jax.experimental import pallas as pl
from jax.experimental.pallas import tpu as pltpu


def make_positional_encoding_table(d_model: int, max_len: int = 5000) -> jnp.ndarray:
    """Deterministic pe buffer, identical to the PyTorch __init__ math."""
    position = jnp.arange(0, max_len, dtype=jnp.float32)[:, None]            # (max_len, 1)
    div_term = jnp.exp(
        jnp.arange(0, d_model, 2, dtype=jnp.float32) * (-math.log(10000.0) / d_model)
    )                                                                         # (d_model/2,)
    angles = position * div_term                                              # (max_len, d_model/2)
    pe = jnp.zeros((max_len, d_model), dtype=jnp.float32)
    pe = pe.at[:, 0::2].set(jnp.sin(angles))
    pe = pe.at[:, 1::2].set(jnp.cos(angles))
    return pe                                                                 # (max_len, d_model)


def _pe_eval_kernel(x_ref, pe_ref, o_ref):
    # x_ref: (B, T) tile of the flattened (B, S*D) input; pe_ref: (1, T) tile.
    o_ref[...] = x_ref[...] + pe_ref[...]


def _pe_dropout_kernel(x_ref, pe_ref, bits_ref, o_ref, *, threshold: int, scale: float):
    # Inverted dropout: keep-test in the integer domain (no int->float convert),
    # scale fused into the select.
    y = x_ref[...] + pe_ref[...]
    keep = (bits_ref[...] & jnp.uint32(0x00FFFFFF)) >= jnp.uint32(threshold)
    o_ref[...] = jnp.where(keep, y * scale, jnp.zeros_like(y))


def _choose_flat_tile(flat_len: int, batch: int, itemsize: int,
                      budget_bytes: int = 12 * 1024 * 1024) -> int:
    """Largest multiple-of-128 divisor of flat_len whose live pipeline footprint
    (~6 double-buffered (B, T) tiles: x, out, bits) fits a conservative budget
    that stays inside v5e's 16 MiB default scoped VMEM (and v6e/v7x limits)."""
    if flat_len < 128 or flat_len % 128 != 0:
        return flat_len                      # full extent: block == array dim is allowed
    max_elems = max(128, budget_bytes // (6 * batch * itemsize))
    best = 128
    cand = 128
    limit = min(flat_len, max_elems)
    while cand <= limit:
        if flat_len % cand == 0:
            best = cand
        cand += 128
    return best


def positional_encoding_forward(x, pe, *, dropout_p=0.1, training=False, seed=0):
    """x: (B, S, D) float32 ; pe: (max_len, D) float32."""
    B, S, D = x.shape
    flat = S * D
    x_flat = x.reshape(B, flat)                       # free reshape, (S, D) is contiguous
    pe_flat = pe[:S, :].reshape(1, flat)              # (1, S*D), lane-dense

    T = _choose_flat_tile(flat, B, x_flat.dtype.itemsize)
    grid = (flat // T,)
    x_spec = pl.BlockSpec((B, T), lambda t: (0, t))
    pe_spec = pl.BlockSpec((1, T), lambda t: (0, t))
    bits_spec = pl.BlockSpec((B, T), lambda t: (0, t))
    out_shape = jax.ShapeDtypeStruct((B, flat), x.dtype)
    cparams = pltpu.CompilerParams(dimension_semantics=("parallel",))

    if not training or dropout_p == 0.0:
        # Dropout is identity in eval mode (matches nn.Dropout semantics).
        out_flat = pl.pallas_call(
            _pe_eval_kernel,
            out_shape=out_shape,
            grid=grid,
            in_specs=[x_spec, pe_spec],
            out_specs=x_spec,
            compiler_params=cparams,
        )(x_flat, pe_flat)
        return out_flat.reshape(B, S, D)

    # Training mode: stochastic inverted dropout.  The RNG stream differs from
    # torch's dropout mask, so only the distribution matches PyTorch training.
    # TODO(synk): on real TPU hardware, pltpu.prng_seed/prng_random_bits inside the
    # kernel would avoid streaming the bits array from HBM, but those primitives
    # have no CPU/interpret lowering, so the bits are generated outside.
    threshold = min(int(round(dropout_p * (1 << 24))), (1 << 24) - 1)
    scale = 1.0 / (1.0 - dropout_p)
    bits = jax.random.bits(jax.random.PRNGKey(seed), (B, flat), dtype=jnp.uint32)

    out_flat = pl.pallas_call(
        functools.partial(_pe_dropout_kernel, threshold=threshold, scale=scale),
        out_shape=out_shape,
        grid=grid,
        in_specs=[x_spec, pe_spec, bits_spec],
        out_specs=x_spec,
        compiler_params=cparams,
    )(x_flat, pe_flat, bits)
    return out_flat.reshape(B, S, D)


if __name__ == "__main__":
    # Small shapes consistent with the module: batch=2, seq=8, d_model=32.
    B, S, D = 2, 8, 32
    key = jax.random.PRNGKey(0)
    x = jax.random.normal(key, (B, S, D), dtype=jnp.float32)

    pe = make_positional_encoding_table(d_model=D, max_len=5000)

    # Eval-mode forward (dropout is identity), matches PyTorch .eval() forward.
    out = jax.block_until_ready(
        positional_encoding_forward(x, pe, dropout_p=0.1, training=False)
    )
    ref = x + pe[:S, :][None, :, :]
    assert out.shape == (B, S, D)
    assert jnp.allclose(out, ref, atol=1e-6), "eval-mode mismatch vs reference"

    # Training-mode (dropout) path: every output element must be either dropped
    # (0) or the kept value scaled by 1/(1-p).
    p = 0.1
    out_train = jax.block_until_ready(
        positional_encoding_forward(x, pe, dropout_p=p, training=True, seed=42)
    )
    assert out_train.shape == (B, S, D)
    scaled = ref / (1.0 - p)
    is_dropped = jnp.abs(out_train) < 1e-6
    is_kept = jnp.abs(out_train - scaled) < 1e-4
    assert bool(jnp.all(is_dropped | is_kept)), "training-mode values inconsistent"

    print("KERNEL_OK")
</pallas_src>

<mosaic_0001>
module attributes {stable_mosaic.version = 11 : i64} {
  func.func @_pe_eval_kernel(%arg0: i32, %arg1: memref<2x256xf32, #tpu.memory_space<vmem>>, %arg2: memref<1x256xf32, #tpu.memory_space<vmem>>, %arg3: memref<2x256xf32, #tpu.memory_space<vmem>>) attributes {dimension_semantics = [#tpu.dimension_semantics<parallel>], iteration_bounds = array<i64: 1>, scalar_prefetch = 0 : i64, scratch_operands = 0 : i64, tpu.core_type = #tpu.core_type<tc>, window_params = [{transform_indices = @transform_0, window_bounds = array<i64: 2, 256>}, {transform_indices = @transform_1, window_bounds = array<i64: 1, 256>}, {transform_indices = @transform_2, window_bounds = array<i64: 2, 256>}]} {
    %c0 = arith.constant 0 : index
    %c0_0 = arith.constant 0 : index
    %0 = vector.load %arg1[%c0, %c0_0] : memref<2x256xf32, #tpu.memory_space<vmem>>, vector<2x256xf32>
    %c0_1 = arith.constant 0 : index
    %c0_2 = arith.constant 0 : index
    %1 = vector.load %arg2[%c0_1, %c0_2] : memref<1x256xf32, #tpu.memory_space<vmem>>, vector<1x256xf32>
    %2 = vector.broadcast %1 : vector<1x256xf32> to vector<2x256xf32>
    %3 = arith.addf %0, %2 : vector<2x256xf32>
    %c0_3 = arith.constant 0 : index
    %c0_4 = arith.constant 0 : index
    %4 = vector.load %arg3[%c0_3, %c0_4] : memref<2x256xf32, #tpu.memory_space<vmem>>, vector<2x256xf32>
    tpu.vector_store %arg3[%c0_3, %c0_4], %3 {strides = array<i32>} : memref<2x256xf32, #tpu.memory_space<vmem>>, vector<2x256xf32>,
    return
  }
  func.func @transform_0(%arg0: i32) -> (i32, i32) {
    %c0_i32 = arith.constant 0 : i32
    %c0_i32_0 = arith.constant 0 : i32
    return %c0_i32, %arg0 : i32, i32
  }
  func.func @transform_1(%arg0: i32) -> (i32, i32) {
    %c0_i32 = arith.constant 0 : i32
    %c0_i32_0 = arith.constant 0 : i32
    return %c0_i32, %arg0 : i32, i32
  }
  func.func @transform_2(%arg0: i32) -> (i32, i32) {
    %c0_i32 = arith.constant 0 : i32
    %c0_i32_0 = arith.constant 0 : i32
    return %c0_i32, %arg0 : i32, i32
  }
}

</mosaic_0001>

<bundles_post_ra>
// kernel: tpu_custom_call.1
= control target key start
LH: loop header
LB: loop body
LE: loop exit
PB: predicated region body
PF: predicated region fallthrough
CT: control target
= control target key end

     0   :  { %7 = vsyncpa [#allocation3], 0  ;;  %s177_s0 = inlined_call_operand.hbm [shape: f32[2,256], index: 0, kind: input, shape index: {}]   ;;  %s178_s1 = inlined_call_operand.hbm [shape: f32[1,256], index: 1, kind: input, shape index: {}]   ;;  %s179_s2 = inlined_call_operand.hbm [shape: f32[2,256], index: 2, kind: output, shape index: {}]  }
   0x1   :  { %8 = vsyncpa [#allocation6], 0 }
   0x2   :  { %9 = vsyncpa [#allocation4], 0  ;;  %s15_s11 = sshll.u32 %s177_s0, 4  ;;  %s150_s12 = smov [#allocation2]   ;;  %s16_s11 = int_to_ptr.hbm [resolvable:$true] %s15_s11 }
   0x3   :  { %s17_s13 = sshll.u32 %s150_s12, 4  ;;  %s26_s16 = sshll.u32 %s178_s1, 4  ;;  %s18_s13 = int_to_ptr.vmem [resolvable:$true] %s17_s13  ;;  %s27_s16 = int_to_ptr.hbm [resolvable:$true] %s26_s16 }
   0x4   :  { %20 = dma.hbm_to_vmem [thread:$0]  %s16_s11, 64, %s18_s13, [#allocation3]  }
   0x5   :  { %s151_s17 = smov [#allocation5]  }
   0x6   :  { %s28_s18 = sshll.u32 %s151_s17, 4  ;;  %s29_s18 = int_to_ptr.vmem [resolvable:$true] %s28_s18 }
   0x7   :  { %31 = dma.hbm_to_vmem [thread:$0]  %s27_s16, 32, %s29_s18, [#allocation6]  }
   0x8   :  { %144 = dma.done.wait [#allocation3], 64  }
   0x9   :  { %145 = vsyncadd [#allocation3], 4294967232 }
   0xa   :  { %146 = dma.done.wait [#allocation6], 32  }
   0xb   :  { %147 = vsyncadd [#allocation6], 4294967264  ;;  %v41_v0 = vld [vmem:[#allocation5] sm:$0x3]  ;;  %vm46_vm0 = vcmask 1041408   ;;  %s152_s0 = smov [#allocation7]  }
   0xc   :  { %v43_v1 = vperm.slane %v41_v0, 0  ;;  %v44_v2 = vperm.slane %v41_v0, 1  ;;  %v40_v3 = vld [vmem:[#allocation2] sm:$0xf]  ;;  %s56_s19 = sshll.u32 %s152_s0, 4  ;;  %s58_s21 = sshll.u32 %s179_s2, 4  ;;  %s57_s19 = int_to_ptr.vmem [resolvable:$true] %s56_s19  ;;  %s59_s21 = int_to_ptr.hbm [resolvable:$true] %s58_s21 }
   0xe   :  { %v45_v4 = vrot.slane %v44_v2, 6 }
  0x10   :  { %v47_v5 = vsel %vm46_vm0, %v43_v1, %v45_v4 }
  0x11   :  { %v49_v6 = vadd.f32 %v47_v5, %v40_v3 }
  0x13   :  { %50 = vst [vmem:[#allocation7] sm:$0xf] %v49_v6 }
  0x14   :  { %61 = dma.vmem_to_hbm [thread:$0]  %s57_s19, 64, %s59_s21, [#allocation4]  }
  0x15   :  { %148 = dma.done.wait [#allocation4], 64  }
  0x16   :  { %149 = vsyncadd [#allocation4], 4294967232 }
  0x17   :  { %66 = vsyncpa [#allocation3], 1 }
  0x18   :  { %67 = vsyncpa [#allocation6], 1 }
  0x19   :  { %68 = vsyncpa [#allocation4], 1 }

</bundles_post_ra>
